<compile_context>
chip_gen: v6e
topology: v6e:2x2x1
jax: 0.10.0
libtpu: 0.0.40
codegen_flags: <defaults>
</compile_context>

<pallas_src>
import jax
import jax.numpy as jnp
from jax.experimental import pallas as pl
from jax.experimental.pallas import tpu as pltpu


def _round_up(x, m):
    return ((x + m - 1) // m) * m


def _conv_matmul_relu_kernel(a_ref, w_ref, b_ref, o_ref):
    # a_ref: (tm, Kpad) bf16 im2col rows, w_ref: (Kpad, tn) bf16 weights,
    # b_ref: (1, tn) f32 bias, o_ref: (tm, tn) output.
    acc = jnp.dot(a_ref[...], w_ref[...], preferred_element_type=jnp.float32)
    acc = acc + b_ref[...]                                   # broadcast bias over rows
    o_ref[...] = jnp.maximum(acc, 0.0).astype(o_ref.dtype)   # fused ReLU


def conv_layer_forward(x, weight, bias, stride=1, *, tm_max=512, tn_max=256,
                       compute_dtype=jnp.bfloat16):
    """x: (N, C, H, W); weight: (O, C, Kh, Kw); bias: (O,). Returns NCHW."""
    N, C, H, W = x.shape
    O, Cw, Kh, Kw = weight.shape
    assert C == Cw
    Ho = (H - Kh) // stride + 1
    Wo = (W - Kw) // stride + 1
    K = C * Kh * Kw
    M = N * Ho * Wo

    # --- im2col via a single XLA op; feature dim ordered (C, Kh, Kw) row-major,
    #     identical to PyTorch's weight.reshape(O, C*Kh*Kw) layout. ---
    patches = jax.lax.conv_general_dilated_patches(
        x, filter_shape=(Kh, Kw), window_strides=(stride, stride),
        padding="VALID", dimension_numbers=("NCHW", "OIHW", "NCHW"))
    # (N, K, Ho, Wo) -> (N*Ho*Wo, K)
    a = patches.transpose(0, 2, 3, 1).reshape(M, K)

    wm = weight.reshape(O, K).T                       # (K, O)
    b2 = bias.reshape(1, O).astype(jnp.float32)

    # --- padding / tile selection ---
    Kpad = _round_up(K, 128)                          # lane-aligned contraction dim
    Npad = _round_up(O, 128)
    if Npad <= tn_max:
        tn = Npad                                     # weight + bias fully resident
    elif Npad % 256 == 0:
        tn = 256
    else:
        tn = 128

    Msub = _round_up(M, 8)
    tm = min(tm_max, Msub)
    # v7x has 2 TensorCores: keep >=2 parallel grid blocks when possible.
    if (Npad // tn) * (Msub // tm if Msub % tm == 0 else Msub // tm + 1) < 2 and Msub >= 16:
        tm = _round_up(pl.cdiv(Msub, 2), 8)
    Mpad = _round_up(M, tm)

    a_pad = jnp.pad(a, ((0, Mpad - M), (0, Kpad - K))).astype(compute_dtype)
    w_pad = jnp.pad(wm, ((0, Kpad - K), (0, Npad - O))).astype(compute_dtype)
    b_pad = jnp.pad(b2, ((0, 0), (0, Npad - O)))

    cost = pl.CostEstimate(
        flops=2 * Mpad * Kpad * Npad,
        transcendentals=0,
        bytes_accessed=(a_pad.size * a_pad.dtype.itemsize
                        + w_pad.size * w_pad.dtype.itemsize
                        + b_pad.size * b_pad.dtype.itemsize
                        + Mpad * Npad * x.dtype.itemsize))

    out = pl.pallas_call(
        _conv_matmul_relu_kernel,
        out_shape=jax.ShapeDtypeStruct((Mpad, Npad), x.dtype),
        grid_spec=pltpu.PrefetchScalarGridSpec(
            num_scalar_prefetch=0,
            # j (output-channel blocks) slow, i (row blocks) fast: the weight /
            # bias block index only changes when j does, so they are DMA'd once
            # per j instead of once per grid step.
            grid=(Npad // tn, Mpad // tm),
            in_specs=[
                pl.BlockSpec((tm, Kpad), lambda j, i: (i, 0)),   # im2col rows tile
                pl.BlockSpec((Kpad, tn), lambda j, i: (0, j)),   # resident weight tile
                pl.BlockSpec((1, tn), lambda j, i: (0, j)),      # resident bias tile
            ],
            out_specs=pl.BlockSpec((tm, tn), lambda j, i: (i, j)),
        ),
        compiler_params=pltpu.CompilerParams(
            dimension_semantics=("parallel", "parallel"),
            vmem_limit_bytes=32 * 1024 * 1024),
        cost_estimate=cost,
    )(a_pad, w_pad, b_pad)

    out = out[:M, :O]                                      # (N*Ho*Wo, O)
    out = out.reshape(N, Ho, Wo, O).transpose(0, 3, 1, 2)  # back to NCHW (module semantics)
    return out


if __name__ == "__main__":
    key = jax.random.PRNGKey(0)
    k1, k2, k3 = jax.random.split(key, 3)

    in_channels, out_channels, kernel_size, stride = 1, 256, 9, 1
    N, H, W = 2, 16, 16   # output spatial = 8x8 -> M = 128 rows

    x = jax.random.normal(k1, (N, in_channels, H, W), dtype=jnp.float32)

    # Deterministic parameter init (Conv2d-style uniform bounds).
    fan_in = in_channels * kernel_size * kernel_size
    bound = 1.0 / (fan_in ** 0.5)
    weight = jax.random.uniform(
        k2, (out_channels, in_channels, kernel_size, kernel_size),
        minval=-bound, maxval=bound, dtype=jnp.float32)
    bias = jax.random.uniform(
        k3, (out_channels,), minval=-bound, maxval=bound, dtype=jnp.float32)

    y = conv_layer_forward(x, weight, bias, stride=stride)
    jax.block_until_ready(y)

    # Reference check against XLA conv (same semantics as F.relu(nn.Conv2d(...)(x))).
    ref = jax.lax.conv_general_dilated(
        x, weight, window_strides=(stride, stride), padding="VALID",
        dimension_numbers=("NCHW", "OIHW", "NCHW"))
    ref = jnp.maximum(ref + bias.reshape(1, -1, 1, 1), 0.0)

    assert y.shape == (N, out_channels, H - kernel_size + 1, W - kernel_size + 1)
    # Tolerance relaxed vs f32: MXU inputs are bf16 (accumulation stays f32).
    assert jnp.allclose(y, ref, atol=2e-2, rtol=2e-2)
    print("KERNEL_OK")
</pallas_src>

<mosaic_0001>
module attributes {stable_mosaic.version = 11 : i64} {
  func.func @_conv_matmul_relu_kernel(%arg0: i32, %arg1: i32, %arg2: memref<64x128xbf16, #tpu.memory_space<vmem>>, %arg3: memref<128x256xbf16, #tpu.memory_space<vmem>>, %arg4: memref<1x256xf32, #tpu.memory_space<vmem>>, %arg5: memref<64x256xf32, #tpu.memory_space<vmem>>) attributes {dimension_semantics = [#tpu.dimension_semantics<parallel>, #tpu.dimension_semantics<parallel>], iteration_bounds = array<i64: 1, 2>, scalar_prefetch = 0 : i64, scratch_operands = 0 : i64, tpu.core_type = #tpu.core_type<tc>, window_params = [{transform_indices = @transform_0, window_bounds = array<i64: 64, 128>}, {transform_indices = @transform_1, window_bounds = array<i64: 128, 256>}, {transform_indices = @transform_2, window_bounds = array<i64: 1, 256>}, {transform_indices = @transform_3, window_bounds = array<i64: 64, 256>}]} {
    %c0 = arith.constant 0 : index
    %c0_0 = arith.constant 0 : index
    %0 = vector.load %arg2[%c0, %c0_0] : memref<64x128xbf16, #tpu.memory_space<vmem>>, vector<64x128xbf16>
    %c0_1 = arith.constant 0 : index
    %c0_2 = arith.constant 0 : index
    %1 = vector.load %arg3[%c0_1, %c0_2] : memref<128x256xbf16, #tpu.memory_space<vmem>>, vector<128x256xbf16>
    %cst = arith.constant dense<0.000000e+00> : vector<64x256xf32>
    %2 = tpu.matmul %0, %1, %cst {dimension_numbers = #tpu.dot_dimension_numbers<[1], [0], [0], [1], [0, 0, 1, 1], [], []>} : vector<64x128xbf16>, vector<128x256xbf16>, vector<64x256xf32> -> vector<64x256xf32>
    %c0_3 = arith.constant 0 : index
    %c0_4 = arith.constant 0 : index
    %3 = vector.load %arg4[%c0_3, %c0_4] : memref<1x256xf32, #tpu.memory_space<vmem>>, vector<1x256xf32>
    %4 = vector.broadcast %3 : vector<1x256xf32> to vector<64x256xf32>
    %5 = arith.addf %2, %4 : vector<64x256xf32>
    %cst_5 = arith.constant 0.000000e+00 : f32
    %6 = vector.broadcast %cst_5 : f32 to vector<64x256xf32>
    %7 = arith.maximumf %5, %6 : vector<64x256xf32>
    %c0_6 = arith.constant 0 : index
    %c0_7 = arith.constant 0 : index
    %8 = vector.load %arg5[%c0_6, %c0_7] : memref<64x256xf32, #tpu.memory_space<vmem>>, vector<64x256xf32>
    tpu.vector_store %arg5[%c0_6, %c0_7], %7 {strides = array<i32>} : memref<64x256xf32, #tpu.memory_space<vmem>>, vector<64x256xf32>,
    return
  }
  func.func @transform_0(%arg0: i32, %arg1: i32) -> (i32, i32) {
    %c0_i32 = arith.constant 0 : i32
    %c0_i32_0 = arith.constant 0 : i32
    return %arg1, %c0_i32 : i32, i32
  }
  func.func @transform_1(%arg0: i32, %arg1: i32) -> (i32, i32) {
    %c0_i32 = arith.constant 0 : i32
    %c0_i32_0 = arith.constant 0 : i32
    return %c0_i32, %arg0 : i32, i32
  }
  func.func @transform_2(%arg0: i32, %arg1: i32) -> (i32, i32) {
    %c0_i32 = arith.constant 0 : i32
    %c0_i32_0 = arith.constant 0 : i32
    return %c0_i32, %arg0 : i32, i32
  }
  func.func @transform_3(%arg0: i32, %arg1: i32) -> (i32, i32) {
    %c0_i32 = arith.constant 0 : i32
    return %arg1, %arg0 : i32, i32
  }
}

</mosaic_0001>

<bundles_post_ra>
// kernel: tpu_custom_call.1
= control target key start
LH: loop header
LB: loop body
LE: loop exit
PB: predicated region body
PF: predicated region fallthrough
CT: control target
= control target key end

     0   :  { %8 = vsyncpa [#allocation3], 0  ;;  %s1166_s0 = inlined_call_operand.hbm [shape: bf16[128,128], index: 0, kind: input, shape index: {}]   ;;  %s1167_s1 = inlined_call_operand.hbm [shape: bf16[128,256], index: 1, kind: input, shape index: {}]   ;;  %s1168_s2 = inlined_call_operand.vmem [shape: f32[1,256], index: 2, kind: input, shape index: {}]   ;;  %s1169_s3 = inlined_call_operand.hbm [shape: f32[128,256], index: 3, kind: output, shape index: {}]  }
   0x1   :  { %10 = vsyncpa [#allocation3 + $0x1], 0 }
   0x2   :  { %11 = vsyncpa [#allocation6], 0 }
   0x3   :  { %12 = vsyncpa [#allocation4], 0 }
   0x4   :  { %14 = vsyncpa [#allocation4 + $0x1], 0  ;;  %s956_s12 = smov 0   ;;  %s958_s13 = smov 0  }
   0x5   :  { %s960_s14 = smov 0   ;;  %s962_s15 = smov 0  }
   0x6   :  { %s964_s16 = smov 0   ;;  %s966_s17 = smov 0  }
   0x7 LB: > { %s620_s18 = sadd.s32 4294967295, %s924_s17   ;;  %s621_s19 = sadd.s32 4294967294, %s924_s17   ;;  %s924_s17 = sphi %s966_s17, %s20_s17   ;;  %s920_s16 = sphi %s964_s16, %s1187_s16   ;;  %s916_s15 = sphi %s962_s15, %s1186_s15   ;;  %s912_s14 = sphi %s960_s14, %s1185_s14   ;;  %s908_s13 = sphi %s958_s13, %s1184_s13   ;;  %s904_s12 = sphi %s956_s12, %s1183_s12  }
   0x8   : > { %p52_p0 = scmp.ne.s32.totalorder %s908_s13, %s904_s12  ;;  %p990_p1 = scmp.eq.s32.totalorder %s620_s18, 0 }
   0x9   : > { %p994_p2 = scmp.eq.s32.totalorder %s620_s18, 1  ;;  %p136_p3 = scmp.eq.s32.totalorder %s621_s19, 1 }
   0xa   : > { %p1000_p4 = por %p990_p1, %p52_p0  ;;  %p622_p5 = scmp.ge.s32.totalorder %s924_s17, 1 }
   0xb   : > { %p1005_p6 = por %p136_p3, %p52_p0  ;;  %p143_p7 = scmp.lt.s32.totalorder %s924_s17, 3 }
   0xc   : > { %s1173_s22 = scalar_select %p1000_p4, 1, 0 }
   0xd   : > { %s1174_s23 = scalar_select %p1005_p6, 1, 0 }
   0xe   : > { %p1010_p8 = pnand %p622_p5, %p143_p7  ;;  %s926_s25 = smov [#allocation5]  }
   0xf   : > { %s158_s26 = sshll.u32 %s926_s25, 4  ;;  %s29_s28 = sadd.s32 1, %s920_s16  ;;  %s159_s26 = int_to_ptr.vmem [resolvable:$true] %s158_s26 }
  0x10   : > { %p686_p9 = pneg %p1010_p8  ;;  %s797_s29 = scalar_lea.vmem %s159_s26, 2048 }
  0x11   : > { %p798_p13 = scmp.ne.s32.totalorder %s159_s26, %s797_s29  ;;  %p805_p5 = scmp.lt.s32.totalorder %s159_s26, %s159_s26 }
  0x12   : > { %p1019_p11 = pnand %p686_p9, %p990_p1  ;;  %p806_p7 = scmp.lt.s32.totalorder %s797_s29, %s797_s29 }
  0x14   : > { %p788_p12 = pneg %p1019_p11  ;;  %p807_p6 = por %p806_p7, %p805_p5 }
  0x16   : > { %p800_p0 = pnand %p798_p13, %p788_p12 }
  0x18   : > { %p801_p3 = pneg %p800_p0 }
  0x1a   : > { %p808_p4 = pnand %p807_p6, %p801_p3 }
  0x1c   : > { %811 = shalt.err (!%p808_p4)
}
  0x1d   : > { %s927_s30 = smov 128   ;;  %s928_s4 = smov 8  }
  0x1e   : > { %689 = dma.hbm_to_vmem [thread:$0]  (!%p1019_p11), %s1167_s1, 2048, %s159_s26, [#allocation6], %s927_s30, %s927_s30, %s928_s4  }
  0x1f   : > { %p30_p6 = scmp.ge.s32.totalorder %s29_s28, 2  ;;  %s39_s7 = sadd.s32 1, %s912_s14 }
  0x20   : > { %p46_p4 = scmp.ne.s32.totalorder %s912_s14, %s908_s13  ;;  %p47_p9 = scmp.eq.s32.totalorder %s924_s17, 0 }
  0x21   : > { %s1189_s28 = smov (%p30_p6, %s29_s28), 0  ;;  %p699_p0 = scmp.lt.s32.totalorder %s924_s17, 2 }
  0x22   : > { %p1037_p12 = por %p47_p9, %p46_p4  ;;  %p1043_p13 = por %p994_p2, %p46_p4 }
  0x23   : > { %s36_s10 = ssub.s32 %s920_s16, %s1189_s28  ;;  %s180_s11 = sand.u32 1, %s912_s14  }
  0x24   : > { %p37_p11 = scmp.eq.s32.totalorder %s36_s10, 0  ;;  %s626_s18 = sshll.u32 %s180_s11, 5 }
  0x25   : > { %s659_s25 = sshll.u32 %s920_s16, 9  ;;  %s184_s30 = scalar_lea.vmem [#allocation2], %s626_s18 }
  0x26   : > { %s1052_s19 = scalar_select %p37_p11, %s912_s14, %s39_s7  }
  0x27   : > { %s190_s29 = scalar_lea.hbm %s1166_s0, %s659_s25  ;;  %s191_s4 = sshll.u32 %s184_s30, 4  ;;  %s192_s4 = int_to_ptr.vmem [resolvable:$true] %s191_s4 }
  0x28   : > { %p1060_p2 = pnand %p699_p0, %p1037_p12  ;;  %s181_s5 = scalar_lea.sflag [#allocation3], %s180_s11 }
  0x29   : > { %s825_s6 = scalar_lea.vmem %s192_s4, 512  ;;  %s929_s7 = smov [#allocation2]  }
  0x2a   : > { %p814_p3 = pneg %p1060_p2  ;;  %p826_p5 = scmp.ne.s32.totalorder %s192_s4, %s825_s6 }
  0x2b   : > { %s830_s10 = sshll.u32 %s929_s7, 4  ;;  %s831_s10 = int_to_ptr.vmem [resolvable:$false] %s830_s10 }
  0x2c   : > { %p828_p7 = pnand %p826_p5, %p814_p3  ;;  %s832_s25 = scalar_lea.vmem %s831_s10, 1024 }
  0x2d   : > { %p833_p4 = scmp.lt.s32.totalorder %s192_s4, %s831_s10  ;;  %p834_p9 = scmp.lt.s32.totalorder %s832_s25, %s825_s6 }
  0x2e   : > { %p829_p6 = pneg %p828_p7 }
  0x2f   : > { %p835_p11 = por %p834_p9, %p833_p4 }
  0x31   : > { %p836_p10 = pnand %p835_p11, %p829_p6 }
  0x33   : > { %839 = shalt.err (!%p836_p10)
}
  0x34   : > { %s930_s8 = smov 64   ;;  %s931_s18 = smov 4  }
  0x35   : > { %693 = dma.hbm_to_vmem [thread:$0]  (!%p1060_p2), %s190_s29, 512, %s192_s4, %s181_s5, %s930_s8, %s930_s8, %s931_s18  }
  0x36   : > { %203 = sbr.rel (%p1010_p8) target bundleno = 321 (0x141), region = 32  ;;  %s1071_s11 = sand.u32 (!%p1010_p8), 1, %s908_s13  }
  0x37   : > { %s630_s26 = sshll.u32 (!%p1010_p8), %s1071_s11, 5  ;;  %s206_s27 = scalar_lea.sflag (!%p1010_p8), [#allocation3], %s1071_s11 }
  0x38   : > { %s1075_s30 = scalar_lea.vmem (!%p1010_p8), [#allocation2], %s630_s26  ;;  %p1180_p12 = scmp.ne.s32.totalorder (!%p1010_p8), %s1173_s22, 0 }
  0x3b   : > { %891 = dma.done.wait (%p1180_p12), %s206_s27, 512  }
  0x3c   : > { %893 = vsyncadd (%p1180_p12), %s206_s27, 4294966784 }
  0x3d   : > { %895 = dma.done.wait (%p990_p1), [#allocation6], 2048  }
  0x3e   : > { %897 = vsyncadd (%p990_p1), [#allocation6], 4294965248  ;;  %v932_v0 = vmov 0   ;;  %v758_v1 = vld [vmem:[#allocation5 + $0x74] ss:$8 sps:$4 sm:$0xff]   ;;  %v782_v17 = vld [vmem:[%s1075_s30] sm:$0xff]   ;;  %v276_v21 = vlaneseq }
  0x3f   : > { %422 = vmatprep.mubr.bf16.mxu0 %v932_v0  ;;  %442 = vmatprep.mubr.bf16.mxu1 %v932_v0  ;;  %v760_v2 = vld [vmem:[#allocation5 + $0x70] ss:$8 sps:$4 sm:$0xff]   ;;  %v761_v3 = vld [vmem:[#allocation5 + $0x64] ss:$8 sps:$4 sm:$0xff]   ;;  %v763_v4 = vld [vmem:[#allocation5 + $0x60] ss:$8 sps:$4 sm:$0xff]  }
  0x40   : > { %390 = vmatprep.subr.bf16.mxu0 %v758_v1  ;;  %662 = vmatprep.subr.bf16.mxu1 %v758_v1  ;;  %v764_v5 = vld [vmem:[#allocation5 + $0x54] ss:$8 sps:$4 sm:$0xff]   ;;  %v766_v6 = vld [vmem:[#allocation5 + $0x50] ss:$8 sps:$4 sm:$0xff]   ;;  %v767_v7 = vld [vmem:[#allocation5 + $0x44] ss:$8 sps:$4 sm:$0xff]  }
  0x41   : > { %391 = vmatpush1.bf16.msra.mxu0 %v760_v2  ;;  %670 = vmatpush1.bf16.msra.mxu1 %v760_v2  ;;  %v769_v8 = vld [vmem:[#allocation5 + $0x40] ss:$8 sps:$4 sm:$0xff]   ;;  %v770_v9 = vld [vmem:[#allocation5 + $0x34] ss:$8 sps:$4 sm:$0xff]   ;;  %v772_v10 = vld [vmem:[#allocation5 + $0x30] ss:$8 sps:$4 sm:$0xff]  }
  0x42   : > { %392 = vmatprep.subr.bf16.mxu0 %v761_v3  ;;  %663 = vmatprep.subr.bf16.mxu1 %v761_v3  ;;  %v773_v11 = vld [vmem:[#allocation5 + $0x24] ss:$8 sps:$4 sm:$0xff]   ;;  %v775_v12 = vld [vmem:[#allocation5 + $0x20] ss:$8 sps:$4 sm:$0xff]   ;;  %v776_v13 = vld [vmem:[#allocation5 + $0x14] ss:$8 sps:$4 sm:$0xff]  }
  0x43   : > { %v778_v14 = vld [vmem:[#allocation5 + $0x10] ss:$8 sps:$4 sm:$0xff]   ;;  %v779_v15 = vld [vmem:[#allocation5 + $0x4] ss:$8 sps:$4 sm:$0xff]   ;;  %v781_v16 = vld [vmem:[#allocation5] ss:$8 sps:$4 sm:$0xff]  }
  0x44   : > { %v783_v18 = vld [vmem:[%s1075_s30 + $0x10] sm:$0xff]   ;;  %v784_v19 = vld [vmem:[%s1075_s30 + $0x8] sm:$0xff]   ;;  %v785_v20 = vld [vmem:[%s1075_s30 + $0x18] sm:$0xff]   ;;  %v277_v22 = vshrl.u32 %v276_v21, 7  ;;  %s632_s24 = sshll.u32 %s1071_s11, 7  ;;  %s661_s4 = sshll.u32 %s916_s15, 11 }
  0x45   : > { %393 = vmatpush1.bf16.msra.mxu0 %v763_v4  ;;  %671 = vmatpush1.bf16.msra.mxu1 %v763_v4  ;;  %v274_v24 = vld [vmem:[%s1168_s2] sm:$0x3]  ;;  %s1093_s29 = scalar_lea.vmem [#allocation7], %s632_s24  ;;  %s1112_s7 = scalar_lea.hbm %s1169_s3, %s661_s4 }
  0x46   : > { %394 = vmatprep.subr.bf16.mxu0 %v764_v5  ;;  %664 = vmatprep.subr.bf16.mxu1 %v764_v5  ;;  %v278_v23 = vsub.s32 0, %v277_v22  ;;  %v282_v25 = vsub.s32 1, %v277_v22  ;;  %s512_s21 = sshll.u32 %s1093_s29, 4  ;;  %s496_s15 = scalar_lea.sflag [#allocation4], %s1071_s11  ;;  %s1114_s21 = int_to_ptr.vmem [resolvable:$true] %s512_s21 }
  0x47   : > { %s840_s10 = scalar_lea.vmem %s1114_s21, 2048  ;;  %s933_s25 = smov [#allocation7]  }
  0x48   : > { %v279_v26 = vrot.slane %v274_v24, %v278_v23  ;;  %v283_v27 = vrot.slane %v274_v24, %v282_v25  ;;  %p841_p1 = scmp.ne.s32.totalorder %s1114_s21, %s840_s10  ;;  %s844_s8 = sshll.u32 %s933_s25, 4  ;;  %s845_s8 = int_to_ptr.vmem [resolvable:$false] %s844_s8 }
  0x49   : > { %395 = vmatpush1.bf16.msra.mxu0 %v766_v6  ;;  %672 = vmatpush1.bf16.msra.mxu1 %v766_v6  ;;  %s846_s18 = scalar_lea.vmem %s845_s8, 4096  ;;  %p847_p0 = scmp.lt.s32.totalorder %s1114_s21, %s845_s8 }
  0x4a   : > { %396 = vmatprep.subr.bf16.mxu0 %v767_v7  ;;  %665 = vmatprep.subr.bf16.mxu1 %v767_v7  ;;  %p842_p8 = pnand %p841_p1, %p1043_p13  ;;  %p848_p2 = scmp.lt.s32.totalorder %s846_s18, %s840_s10 }
  0x4c   : > { %p843_p10 = pneg %p842_p8  ;;  %p849_p3 = por %p848_p2, %p847_p0 }
  0x4d   : > { %397 = vmatpush1.bf16.msra.mxu0 %v769_v8  ;;  %673 = vmatpush1.bf16.msra.mxu1 %v769_v8 }
  0x4e   : > { %398 = vmatprep.subr.bf16.mxu0 %v770_v9  ;;  %666 = vmatprep.subr.bf16.mxu1 %v770_v9  ;;  %p850_p5 = pnand %p849_p3, %p843_p10 }
  0x51   : > { %399 = vmatpush1.bf16.msra.mxu0 %v772_v10  ;;  %674 = vmatpush1.bf16.msra.mxu1 %v772_v10 }
  0x52   : > { %400 = vmatprep.subr.bf16.mxu0 %v773_v11  ;;  %667 = vmatprep.subr.bf16.mxu1 %v773_v11 }
  0x55   : > { %401 = vmatpush1.bf16.msra.mxu0 %v775_v12  ;;  %675 = vmatpush1.bf16.msra.mxu1 %v775_v12 }
  0x56   : > { %402 = vmatprep.subr.bf16.mxu0 %v776_v13  ;;  %668 = vmatprep.subr.bf16.mxu1 %v776_v13 }
  0x59   : > { %403 = vmatpush1.bf16.msra.mxu0 %v778_v14  ;;  %676 = vmatpush1.bf16.msra.mxu1 %v778_v14 }
  0x5a   : > { %404 = vmatprep.subr.bf16.mxu0 %v779_v15  ;;  %669 = vmatprep.subr.bf16.mxu1 %v779_v15 }
  0x5d   : > { %405 = vmatpush1.bf16.msra.mxu0 %v781_v16  ;;  %677 = vmatpush1.bf16.msra.mxu1 %v781_v16 }
  0x60   : > { %423 = vmatmul.mubr.bf16.vlgmr.msra.gmra.mxu0 %v782_v17  ;;  %443 = vmatmul.mubr.bf16.vlgmr.msra.gmra.mxu1 %v783_v18 }
  0x61   : > { %432 = vmatprep.mubr.bf16.mxu0 %v932_v0  ;;  %452 = vmatprep.mubr.bf16.mxu1 %v932_v0 }
  0x68   : > { %433 = vmatmul.mubr.bf16.gmra.mxu0 %v784_v19  ;;  %453 = vmatmul.mubr.bf16.gmra.mxu1 %v785_v20 }
 0x120   : > { %v424_v28 = vpop.f32.mrf.mxu0  ;;  %v444_v29 = vpop.f32.mrf.mxu1 }
 0x121   : > { %v425_v30 = vadd.f32 %v424_v28, %v279_v26  ;;  %v445_v31 = vadd.f32 %v444_v29, %v279_v26 }
 0x122   : > { %v426_v32 = vpop.f32.mrf.mxu0  ;;  %v446_v33 = vpop.f32.mrf.mxu1 }
 0x123   : > { %v463_v34 = vmax.f32 %v425_v30, 0.0  ;;  %v471_v35 = vmax.f32 %v445_v31, 0.0  ;;  %v427_v36 = vadd.f32 %v426_v32, %v283_v27  ;;  %v447_v37 = vadd.f32 %v446_v33, %v283_v27 }
 0x124   : > { %v428_v38 = vpop.f32.mrf.mxu0  ;;  %v448_v39 = vpop.f32.mrf.mxu1 }
 0x125   : > { %479 = vst [vmem:[%s1093_s29] sm:$0xff] %v463_v34  ;;  %487 = vst [vmem:[%s1093_s29 + $0x40] sm:$0xff] %v471_v35  ;;  %v464_v40 = vmax.f32 %v427_v36, 0.0  ;;  %v472_v41 = vmax.f32 %v447_v37, 0.0  ;;  %v429_v42 = vadd.f32 %v428_v38, %v279_v26  ;;  %v449_v43 = vadd.f32 %v448_v39, %v279_v26 }
 0x126   : > { %v430_v44 = vpop.f32.mrf.mxu0  ;;  %v450_v45 = vpop.f32.mrf.mxu1 }
 0x127   : > { %480 = vst [vmem:[%s1093_s29 + $0x8] sm:$0xff] %v464_v40  ;;  %488 = vst [vmem:[%s1093_s29 + $0x48] sm:$0xff] %v472_v41  ;;  %v465_v46 = vmax.f32 %v429_v42, 0.0  ;;  %v473_v47 = vmax.f32 %v449_v43, 0.0  ;;  %v431_v48 = vadd.f32 %v430_v44, %v283_v27  ;;  %v451_v49 = vadd.f32 %v450_v45, %v283_v27 }
 0x128   : > { %v434_v50 = vpop.f32.mrf.mxu0  ;;  %v454_v51 = vpop.f32.mrf.mxu1 }
 0x129   : > { %481 = vst [vmem:[%s1093_s29 + $0x10] sm:$0xff] %v465_v46  ;;  %489 = vst [vmem:[%s1093_s29 + $0x50] sm:$0xff] %v473_v47  ;;  %v466_v52 = vmax.f32 %v431_v48, 0.0  ;;  %v474_v53 = vmax.f32 %v451_v49, 0.0  ;;  %v435_v54 = vadd.f32 %v434_v50, %v279_v26  ;;  %v455_v55 = vadd.f32 %v454_v51, %v279_v26 }
 0x12a   : > { %v436_v56 = vpop.f32.mrf.mxu0  ;;  %v456_v57 = vpop.f32.mrf.mxu1 }
 0x12b   : > { %482 = vst [vmem:[%s1093_s29 + $0x18] sm:$0xff] %v466_v52  ;;  %490 = vst [vmem:[%s1093_s29 + $0x58] sm:$0xff] %v474_v53  ;;  %v467_v58 = vmax.f32 %v435_v54, 0.0  ;;  %v475_v59 = vmax.f32 %v455_v55, 0.0  ;;  %v437_v60 = vadd.f32 %v436_v56, %v283_v27  ;;  %v457_v61 = vadd.f32 %v456_v57, %v283_v27 }
 0x12c   : > { %v438_v62 = vpop.f32.mrf.mxu0  ;;  %v458_v63 = vpop.f32.mrf.mxu1 }
 0x12d   : > { %483 = vst [vmem:[%s1093_s29 + $0x20] sm:$0xff] %v467_v58  ;;  %491 = vst [vmem:[%s1093_s29 + $0x60] sm:$0xff] %v475_v59  ;;  %v468_v0 = vmax.f32 %v437_v60, 0.0  ;;  %v476_v1 = vmax.f32 %v457_v61, 0.0  ;;  %v439_v2 = vadd.f32 %v438_v62, %v279_v26  ;;  %v459_v3 = vadd.f32 %v458_v63, %v279_v26 }
 0x12e   : > { %v440_v4 = vpop.f32.mrf.mxu0  ;;  %v460_v5 = vpop.f32.mrf.mxu1 }
 0x12f   : > { %484 = vst [vmem:[%s1093_s29 + $0x28] sm:$0xff] %v468_v0  ;;  %492 = vst [vmem:[%s1093_s29 + $0x68] sm:$0xff] %v476_v1  ;;  %v469_v6 = vmax.f32 %v439_v2, 0.0  ;;  %v477_v7 = vmax.f32 %v459_v3, 0.0  ;;  %v441_v8 = vadd.f32 %v440_v4, %v283_v27  ;;  %v461_v9 = vadd.f32 %v460_v5, %v283_v27 }
 0x131   : > { %485 = vst [vmem:[%s1093_s29 + $0x30] sm:$0xff] %v469_v6  ;;  %493 = vst [vmem:[%s1093_s29 + $0x70] sm:$0xff] %v477_v7  ;;  %v470_v10 = vmax.f32 %v441_v8, 0.0  ;;  %v478_v11 = vmax.f32 %v461_v9, 0.0 }
 0x133   : > { %486 = vst [vmem:[%s1093_s29 + $0x38] sm:$0xff] %v470_v10  ;;  %494 = vst [vmem:[%s1093_s29 + $0x78] sm:$0xff] %v478_v11 }
 0x134   : > { %853 = shalt.err (!%p850_p5)
}
 0x135   : > { %s854_s26 = scalar_lea.hbm %s1112_s7, 2048  ;;  %s858_s20 = scalar_lea.hbm %s1169_s3, 4096 }
 0x136   : > { %p855_p7 = scmp.ne.s32.totalorder %s1112_s7, %s854_s26  ;;  %p859_p9 = scmp.lt.s32.totalorder %s1112_s7, %s1169_s3 }
 0x137   : > { %p860_p11 = scmp.lt.s32.totalorder %s858_s20, %s854_s26 }
 0x138   : > { %p856_p6 = pnand %p855_p7, %p1043_p13 }
 0x139   : > { %p861_p12 = por %p860_p11, %p859_p9 }
 0x13a   : > { %p857_p4 = pneg %p856_p6 }
 0x13c   : > { %p862_p1 = pnand %p861_p12, %p857_p4 }
 0x13e   : > { %865 = shalt.err (!%p862_p1)
}
 0x13f   : > { %s934_s29 = smov 256   ;;  %s935_s4 = smov 16  }
 0x140   : > { %684 = dma.vmem_to_hbm [thread:$0]  (%p1043_p13), %s1114_s21, 2048, %s1112_s7, %s496_s15, %s934_s29, %s934_s29, %s935_s4  }
 0x141 PF: > { %s527_s5 = sand.u32 1, %s904_s12   ;;  %p1181_p8 = scmp.ne.s32.totalorder %s1174_s23, 0 }
 0x142   : > { %p1182_p10 = scmp.ge.s32.totalorder %s924_s17, 2  ;;  %s528_s6 = scalar_lea.sflag [#allocation4], %s527_s5 }
 0x144   : > { %p695_p0 = pnand %p1182_p10, %p1181_p8 }
 0x146   : > { %p696_p2 = pneg %p695_p0 }
 0x148   : > { %899 = dma.done.wait (%p696_p2), %s528_s6, 2048  }
 0x149   : > { %901 = vsyncadd (%p696_p2), %s528_s6, 4294965248  ;;  %s20_s17 = sadd.s32 1, %s924_s17   ;;  %s1183_s12 = smov %s908_s13 }
 0x14a   : > { %p17_p3 = scmp.ge.s32.totalorder %s20_s17, 4   ;;  %s1184_s13 = smov %s912_s14 }
 0x14b   : > { %s1185_s14 = smov %s1052_s19  ;;  %s1186_s15 = smov %s920_s16 }
 0x14c   : > { %s1187_s16 = smov %s1189_s28  ;;  %19 = sbr.rel (!%p17_p3) target bundleno = 7 (0x7), region = 85 }
 0x151   :  { %533 = vsyncpa [#allocation3], 1 }
 0x152   :  { %535 = vsyncpa [#allocation3 + $0x1], 1 }
 0x153   :  { %536 = vsyncpa [#allocation6], 1 }
 0x154   :  { %537 = vsyncpa [#allocation4], 1 }
 0x155   :  { %539 = vsyncpa [#allocation4 + $0x1], 1 }

</bundles_post_ra>
